<compile_context>
chip_gen: v6e
topology: v6e:2x2x1
jax: 0.10.0
libtpu: 0.0.40
codegen_flags: <defaults>
</compile_context>

<pallas_src>
import functools

import jax
import jax.numpy as jnp
from jax.experimental import pallas as pl
from jax.experimental.pallas import tpu as pltpu

_LANE = 128
_MAX_HW_TILE = 2048   # lanes per spatial tile (e.g. 64ch * 2048 * 4B = 512 KiB / block)


def _channel_attention_kernel(x_ref, w1_ref, b1_ref, w2_ref, b2_ref, o_ref,
                              sum_acc, max_acc, gate_acc,
                              *, real_hw, hw_tile, padded):
    phase = pl.program_id(1)
    hw_idx = pl.program_id(2)

    # ---- phase 0: running sum / max pooling over spatial tiles ----------
    @pl.when(jnp.logical_and(phase == 0, hw_idx == 0))
    def _init():
        sum_acc[...] = jnp.zeros_like(sum_acc)
        max_acc[...] = jnp.full(max_acc.shape, -jnp.inf, dtype=max_acc.dtype)

    @pl.when(phase == 0)
    def _pool():
        xf = x_ref[...].astype(jnp.float32)            # (1, C, hw_tile)
        if padded:  # static branch: mask lanes past the real spatial extent
            lane = jax.lax.broadcasted_iota(jnp.int32, xf.shape, 2)
            valid = (hw_idx * hw_tile + lane) < real_hw
            x_sum = jnp.where(valid, xf, 0.0)
            x_max = jnp.where(valid, xf, -jnp.inf)
        else:
            x_sum = xf
            x_max = xf
        sum_acc[...] += jnp.sum(x_sum, axis=2)
        max_acc[...] = jnp.maximum(max_acc[...], jnp.max(x_max, axis=2))

    # ---- phase 1, first tile: fused MLP on stacked (avg, max) + sigmoid --
    @pl.when(jnp.logical_and(phase == 1, hw_idx == 0))
    def _gate():
        avg = sum_acc[...] * (1.0 / real_hw)            # (1, C)  AdaptiveAvgPool2d(1)
        mx = max_acc[...]                               # (1, C)  AdaptiveMaxPool2d(1)
        pooled = jnp.concatenate([avg, mx], axis=0)     # (2, C) -> single MXU pass
        hid = jnp.dot(pooled, w1_ref[...],
                      preferred_element_type=jnp.float32) + b1_ref[...]
        hid = hid * jax.nn.sigmoid(hid)                 # SiLU
        out = jnp.dot(hid, w2_ref[...],
                      preferred_element_type=jnp.float32) + b2_ref[...]
        gate_acc[...] = jax.nn.sigmoid(out[0:1, :] + out[1:2, :])   # (1, C)

    # ---- phase 1: stream spatial tiles, scale by the cached gate ---------
    @pl.when(phase == 1)
    def _scale():
        gate = gate_acc[...].astype(o_ref.dtype)        # (1, C), native dtype
        o_ref[...] = x_ref[...] * gate[:, :, None]      # keep bulk path in x dtype


def channel_attention(x_nchw, w1, b1, w2, b2):
    """CBAM channel attention.  x_nchw: (B, C, H, W); returns same shape."""
    B, C, H, W = x_nchw.shape
    HW = H * W
    itemsize = jnp.dtype(x_nchw.dtype).itemsize

    # Lane-dense spatial tiling: tile is a multiple of 128 lanes.
    hw_lane = pl.cdiv(HW, _LANE) * _LANE
    hw_tile = min(hw_lane, _MAX_HW_TILE)
    n_hw = pl.cdiv(HW, hw_tile)
    hw_pad = n_hw * hw_tile
    padded = hw_pad != HW

    x_flat = x_nchw.reshape(B, C, HW)
    if padded:
        x_flat = jnp.pad(x_flat, ((0, 0), (0, 0), (0, hw_pad - HW)))

    kernel = functools.partial(_channel_attention_kernel,
                               real_hw=HW, hw_tile=hw_tile, padded=padded)

    grid = (B, 2, n_hw)   # (batch, phase, spatial tiles); reduction axes last

    out_flat = pl.pallas_call(
        kernel,
        out_shape=jax.ShapeDtypeStruct((B, C, hw_pad), x_nchw.dtype),
        grid_spec=pltpu.PrefetchScalarGridSpec(
            num_scalar_prefetch=0,
            grid=grid,
            in_specs=[
                pl.BlockSpec((1, C, hw_tile), lambda b, p, h: (b, 0, h)),
                pl.BlockSpec(w1.shape, lambda b, p, h: (0, 0)),
                pl.BlockSpec(b1.shape, lambda b, p, h: (0, 0)),
                pl.BlockSpec(w2.shape, lambda b, p, h: (0, 0)),
                pl.BlockSpec(b2.shape, lambda b, p, h: (0, 0)),
            ],
            # During phase 0 the output block index is pinned to (b, 0, 0), so
            # nothing is flushed; phase 1 writes every tile exactly once.
            out_specs=pl.BlockSpec((1, C, hw_tile),
                                   lambda b, p, h: (b, 0, h * p)),
            scratch_shapes=[
                pltpu.VMEM((1, C), jnp.float32),   # running channel sum
                pltpu.VMEM((1, C), jnp.float32),   # running channel max
                pltpu.VMEM((1, C), jnp.float32),   # sigmoid gate (per batch)
            ],
        ),
        compiler_params=pltpu.CompilerParams(
            dimension_semantics=("parallel", "arbitrary", "arbitrary")),
        cost_estimate=pl.CostEstimate(
            flops=3 * B * C * hw_pad,
            transcendentals=3 * B * C,
            bytes_accessed=3 * B * C * hw_pad * itemsize),
    )(x_flat, w1, b1, w2, b2)

    if padded:
        out_flat = out_flat[:, :, :HW]
    return out_flat.reshape(B, C, H, W)


def reference(x, w1, b1, w2, b2):
    avg = jnp.mean(x, axis=(2, 3))
    mx = jnp.max(x, axis=(2, 3))

    def mlp(v):
        h = v @ w1 + b1
        h = h * jax.nn.sigmoid(h)
        return h @ w2 + b2

    out = mlp(avg) + mlp(mx)
    gate = jax.nn.sigmoid(out)[:, :, None, None]
    return x * gate


if __name__ == "__main__":
    key = jax.random.PRNGKey(0)
    B, C, H, W = 2, 64, 16, 16
    reduction_ratio = 16
    Cr = C // reduction_ratio  # 4

    k_x, k_w1, k_b1, k_w2, k_b2 = jax.random.split(key, 5)
    x = jax.random.normal(k_x, (B, C, H, W), dtype=jnp.float32)

    # PyTorch Linear(C, Cr) stores weight (Cr, C); we keep the transposed
    # (C, Cr) layout so y = x @ W + b.
    w1 = 0.1 * jax.random.normal(k_w1, (C, Cr), dtype=jnp.float32)
    b1 = 0.1 * jax.random.normal(k_b1, (1, Cr), dtype=jnp.float32)
    w2 = 0.1 * jax.random.normal(k_w2, (Cr, C), dtype=jnp.float32)
    b2 = 0.1 * jax.random.normal(k_b2, (1, C), dtype=jnp.float32)

    out = channel_attention(x, w1, b1, w2, b2)
    out = jax.block_until_ready(out)

    ref = reference(x, w1, b1.reshape(-1), w2, b2.reshape(-1))
    assert out.shape == (B, C, H, W)
    assert jnp.allclose(out, ref, atol=1e-5, rtol=1e-5), "mismatch vs reference"

    print("KERNEL_OK")
</pallas_src>

<mosaic_0001>
module attributes {stable_mosaic.version = 11 : i64} {
  func.func @_channel_attention_kernel(%arg0: i32, %arg1: i32, %arg2: i32, %arg3: memref<1x64x256xf32, #tpu.memory_space<vmem>>, %arg4: memref<64x4xf32, #tpu.memory_space<vmem>>, %arg5: memref<1x4xf32, #tpu.memory_space<vmem>>, %arg6: memref<4x64xf32, #tpu.memory_space<vmem>>, %arg7: memref<1x64xf32, #tpu.memory_space<vmem>>, %arg8: memref<1x64x256xf32, #tpu.memory_space<vmem>>, %arg9: memref<1x64xf32, #tpu.memory_space<vmem>>, %arg10: memref<1x64xf32, #tpu.memory_space<vmem>>, %arg11: memref<1x64xf32, #tpu.memory_space<vmem>>) attributes {dimension_semantics = [#tpu.dimension_semantics<parallel>, #tpu.dimension_semantics<arbitrary>, #tpu.dimension_semantics<arbitrary>], iteration_bounds = array<i64: 2, 2, 1>, scalar_prefetch = 0 : i64, scratch_operands = 3 : i64, tpu.core_type = #tpu.core_type<tc>, window_params = [{transform_indices = @transform_0, window_bounds = array<i64: 1, 64, 256>}, {pipeline_mode = #tpu.pipeline_mode<synchronous>, transform_indices = @transform_1, window_bounds = array<i64: 64, 4>}, {pipeline_mode = #tpu.pipeline_mode<synchronous>, transform_indices = @transform_2, window_bounds = array<i64: 1, 4>}, {pipeline_mode = #tpu.pipeline_mode<synchronous>, transform_indices = @transform_3, window_bounds = array<i64: 4, 64>}, {pipeline_mode = #tpu.pipeline_mode<synchronous>, transform_indices = @transform_4, window_bounds = array<i64: 1, 64>}, {transform_indices = @transform_5, window_bounds = array<i64: 1, 64, 256>}]} {
    %c0_i32 = arith.constant 0 : i32
    %0 = arith.cmpi eq, %arg1, %c0_i32 : i32
    %c0_i32_0 = arith.constant 0 : i32
    %1 = arith.cmpi eq, %arg2, %c0_i32_0 : i32
    %2 = arith.andi %0, %1 : i1
    %3 = arith.extui %2 : i1 to i32
    %c0_i32_1 = arith.constant 0 : i32
    %4 = arith.cmpi ne, %3, %c0_i32_1 : i32
    scf.if %4 {
      %cst = arith.constant 0.000000e+00 : f32
      %16 = vector.broadcast %cst : f32 to vector<1x64xf32>
      %c0 = arith.constant 0 : index
      %c0_8 = arith.constant 0 : index
      %17 = vector.load %arg9[%c0, %c0_8] : memref<1x64xf32, #tpu.memory_space<vmem>>, vector<1x64xf32>
      tpu.vector_store %arg9[%c0, %c0_8], %16 {strides = array<i32>} : memref<1x64xf32, #tpu.memory_space<vmem>>, vector<1x64xf32>,
      %cst_9 = arith.constant 0xFF800000 : f32
      %18 = vector.broadcast %cst_9 : f32 to vector<1x64xf32>
      %c0_10 = arith.constant 0 : index
      %c0_11 = arith.constant 0 : index
      %19 = vector.load %arg10[%c0_10, %c0_11] : memref<1x64xf32, #tpu.memory_space<vmem>>, vector<1x64xf32>
      tpu.vector_store %arg10[%c0_10, %c0_11], %18 {strides = array<i32>} : memref<1x64xf32, #tpu.memory_space<vmem>>, vector<1x64xf32>,
    } else {
    }
    %c0_i32_2 = arith.constant 0 : i32
    %5 = arith.cmpi eq, %arg1, %c0_i32_2 : i32
    %6 = arith.extui %5 : i1 to i32
    %c0_i32_3 = arith.constant 0 : i32
    %7 = arith.cmpi ne, %6, %c0_i32_3 : i32
    scf.if %7 {
      %c0 = arith.constant 0 : index
      %c0_8 = arith.constant 0 : index
      %c0_9 = arith.constant 0 : index
      %16 = vector.load %arg3[%c0, %c0_8, %c0_9] : memref<1x64x256xf32, #tpu.memory_space<vmem>>, vector<1x64x256xf32>
      %c0_10 = arith.constant 0 : index
      %c0_11 = arith.constant 0 : index
      %17 = vector.load %arg9[%c0_10, %c0_11] : memref<1x64xf32, #tpu.memory_space<vmem>>, vector<1x64xf32>
      %cst = arith.constant dense<0.000000e+00> : vector<1x64xf32>
      %18 = vector.multi_reduction <add>, %16, %cst [2] : vector<1x64x256xf32> to vector<1x64xf32>
      %19 = arith.addf %17, %18 : vector<1x64xf32>
      %c0_12 = arith.constant 0 : index
      %c0_13 = arith.constant 0 : index
      %20 = vector.load %arg9[%c0_12, %c0_13] : memref<1x64xf32, #tpu.memory_space<vmem>>, vector<1x64xf32>
      tpu.vector_store %arg9[%c0_12, %c0_13], %19 {strides = array<i32>} : memref<1x64xf32, #tpu.memory_space<vmem>>, vector<1x64xf32>,
      %c0_14 = arith.constant 0 : index
      %c0_15 = arith.constant 0 : index
      %21 = vector.load %arg10[%c0_14, %c0_15] : memref<1x64xf32, #tpu.memory_space<vmem>>, vector<1x64xf32>
      %cst_16 = arith.constant dense<0xFF800000> : vector<1x64xf32>
      %22 = vector.multi_reduction <maximumf>, %16, %cst_16 [2] : vector<1x64x256xf32> to vector<1x64xf32>
      %23 = arith.maximumf %21, %22 : vector<1x64xf32>
      %c0_17 = arith.constant 0 : index
      %c0_18 = arith.constant 0 : index
      %24 = vector.load %arg10[%c0_17, %c0_18] : memref<1x64xf32, #tpu.memory_space<vmem>>, vector<1x64xf32>
      tpu.vector_store %arg10[%c0_17, %c0_18], %23 {strides = array<i32>} : memref<1x64xf32, #tpu.memory_space<vmem>>, vector<1x64xf32>,
    } else {
    }
    %c1_i32 = arith.constant 1 : i32
    %8 = arith.cmpi eq, %arg1, %c1_i32 : i32
    %c0_i32_4 = arith.constant 0 : i32
    %9 = arith.cmpi eq, %arg2, %c0_i32_4 : i32
    %10 = arith.andi %8, %9 : i1
    %11 = arith.extui %10 : i1 to i32
    %c0_i32_5 = arith.constant 0 : i32
    %12 = arith.cmpi ne, %11, %c0_i32_5 : i32
    scf.if %12 {
      %c0 = arith.constant 0 : index
      %c0_8 = arith.constant 0 : index
      %16 = vector.load %arg9[%c0, %c0_8] : memref<1x64xf32, #tpu.memory_space<vmem>>, vector<1x64xf32>
      %cst = arith.constant 3.906250e-03 : f32
      %17 = vector.broadcast %cst : f32 to vector<1x64xf32>
      %18 = arith.mulf %16, %17 : vector<1x64xf32>
      %c0_9 = arith.constant 0 : index
      %c0_10 = arith.constant 0 : index
      %19 = vector.load %arg10[%c0_9, %c0_10] : memref<1x64xf32, #tpu.memory_space<vmem>>, vector<1x64xf32>
      %20 = tpu.concatenate %18, %19 in 0 : vector<1x64xf32>, vector<1x64xf32> -> vector<2x64xf32>
      %c0_11 = arith.constant 0 : index
      %c0_12 = arith.constant 0 : index
      %21 = vector.load %arg4[%c0_11, %c0_12] : memref<64x4xf32, #tpu.memory_space<vmem>>, vector<64x4xf32>
      %cst_13 = arith.constant dense<0.000000e+00> : vector<2x4xf32>
      %22 = tpu.matmul %20, %21, %cst_13 {dimension_numbers = #tpu.dot_dimension_numbers<[1], [0], [0], [1], [0, 0, 1, 1], [], []>} : vector<2x64xf32>, vector<64x4xf32>, vector<2x4xf32> -> vector<2x4xf32>
      %c0_14 = arith.constant 0 : index
      %c0_15 = arith.constant 0 : index
      %23 = vector.load %arg5[%c0_14, %c0_15] : memref<1x4xf32, #tpu.memory_space<vmem>>, vector<1x4xf32>
      %24 = vector.broadcast %23 : vector<1x4xf32> to vector<2x4xf32>
      %25 = arith.addf %22, %24 : vector<2x4xf32>
      %26 = arith.negf %25 : vector<2x4xf32>
      %27 = math.exp %26 : vector<2x4xf32>
      %cst_16 = arith.constant 1.000000e+00 : f32
      %28 = vector.broadcast %cst_16 : f32 to vector<2x4xf32>
      %29 = arith.addf %28, %27 : vector<2x4xf32>
      %30 = arith.divf %28, %29 : vector<2x4xf32>
      %31 = arith.mulf %25, %30 : vector<2x4xf32>
      %c0_17 = arith.constant 0 : index
      %c0_18 = arith.constant 0 : index
      %32 = vector.load %arg6[%c0_17, %c0_18] : memref<4x64xf32, #tpu.memory_space<vmem>>, vector<4x64xf32>
      %cst_19 = arith.constant dense<0.000000e+00> : vector<2x64xf32>
      %33 = tpu.matmul %31, %32, %cst_19 {dimension_numbers = #tpu.dot_dimension_numbers<[1], [0], [0], [1], [0, 0, 1, 1], [], []>} : vector<2x4xf32>, vector<4x64xf32>, vector<2x64xf32> -> vector<2x64xf32>
      %c0_20 = arith.constant 0 : index
      %c0_21 = arith.constant 0 : index
      %34 = vector.load %arg7[%c0_20, %c0_21] : memref<1x64xf32, #tpu.memory_space<vmem>>, vector<1x64xf32>
      %35 = vector.broadcast %34 : vector<1x64xf32> to vector<2x64xf32>
      %36 = arith.addf %33, %35 : vector<2x64xf32>
      %37 = vector.extract_strided_slice %36 {offsets = [0, 0], sizes = [1, 64], strides = [1, 1]} : vector<2x64xf32> to vector<1x64xf32>
      %38 = vector.extract_strided_slice %36 {offsets = [1, 0], sizes = [1, 64], strides = [1, 1]} : vector<2x64xf32> to vector<1x64xf32>
      %39 = arith.addf %37, %38 : vector<1x64xf32>
      %40 = arith.negf %39 : vector<1x64xf32>
      %41 = math.exp %40 : vector<1x64xf32>
      %cst_22 = arith.constant 1.000000e+00 : f32
      %42 = vector.broadcast %cst_22 : f32 to vector<1x64xf32>
      %43 = arith.addf %42, %41 : vector<1x64xf32>
      %44 = arith.divf %42, %43 : vector<1x64xf32>
      %c0_23 = arith.constant 0 : index
      %c0_24 = arith.constant 0 : index
      %45 = vector.load %arg11[%c0_23, %c0_24] : memref<1x64xf32, #tpu.memory_space<vmem>>, vector<1x64xf32>
      tpu.vector_store %arg11[%c0_23, %c0_24], %44 {strides = array<i32>} : memref<1x64xf32, #tpu.memory_space<vmem>>, vector<1x64xf32>,
    } else {
    }
    %c1_i32_6 = arith.constant 1 : i32
    %13 = arith.cmpi eq, %arg1, %c1_i32_6 : i32
    %14 = arith.extui %13 : i1 to i32
    %c0_i32_7 = arith.constant 0 : i32
    %15 = arith.cmpi ne, %14, %c0_i32_7 : i32
    scf.if %15 {
      %c0 = arith.constant 0 : index
      %c0_8 = arith.constant 0 : index
      %16 = vector.load %arg11[%c0, %c0_8] : memref<1x64xf32, #tpu.memory_space<vmem>>, vector<1x64xf32>
      %c0_9 = arith.constant 0 : index
      %c0_10 = arith.constant 0 : index
      %c0_11 = arith.constant 0 : index
      %17 = vector.load %arg3[%c0_9, %c0_10, %c0_11] : memref<1x64x256xf32, #tpu.memory_space<vmem>>, vector<1x64x256xf32>
      %18 = vector.shape_cast %16 : vector<1x64xf32> to vector<1x64x1xf32>
      %19 = vector.broadcast %18 : vector<1x64x1xf32> to vector<1x64x256xf32>
      %20 = arith.mulf %17, %19 : vector<1x64x256xf32>
      %c0_12 = arith.constant 0 : index
      %c0_13 = arith.constant 0 : index
      %c0_14 = arith.constant 0 : index
      %21 = vector.load %arg8[%c0_12, %c0_13, %c0_14] : memref<1x64x256xf32, #tpu.memory_space<vmem>>, vector<1x64x256xf32>
      tpu.vector_store %arg8[%c0_12, %c0_13, %c0_14], %20 {strides = array<i32>} : memref<1x64x256xf32, #tpu.memory_space<vmem>>, vector<1x64x256xf32>,
    } else {
    }
    return
  }
  func.func @transform_0(%arg0: i32, %arg1: i32, %arg2: i32) -> (i32, i32, i32) {
    %c0_i32 = arith.constant 0 : i32
    %c0_i32_0 = arith.constant 0 : i32
    return %arg0, %c0_i32, %arg2 : i32, i32, i32
  }
  func.func @transform_1(%arg0: i32, %arg1: i32, %arg2: i32) -> (i32, i32) {
    %c0_i32 = arith.constant 0 : i32
    %c0_i32_0 = arith.constant 0 : i32
    %c0_i32_1 = arith.constant 0 : i32
    return %c0_i32, %c0_i32_0 : i32, i32
  }
  func.func @transform_2(%arg0: i32, %arg1: i32, %arg2: i32) -> (i32, i32) {
    %c0_i32 = arith.constant 0 : i32
    %c0_i32_0 = arith.constant 0 : i32
    %c0_i32_1 = arith.constant 0 : i32
    return %c0_i32, %c0_i32_0 : i32, i32
  }
  func.func @transform_3(%arg0: i32, %arg1: i32, %arg2: i32) -> (i32, i32) {
    %c0_i32 = arith.constant 0 : i32
    %c0_i32_0 = arith.constant 0 : i32
    %c0_i32_1 = arith.constant 0 : i32
    return %c0_i32, %c0_i32_0 : i32, i32
  }
  func.func @transform_4(%arg0: i32, %arg1: i32, %arg2: i32) -> (i32, i32) {
    %c0_i32 = arith.constant 0 : i32
    %c0_i32_0 = arith.constant 0 : i32
    %c0_i32_1 = arith.constant 0 : i32
    return %c0_i32, %c0_i32_0 : i32, i32
  }
  func.func @transform_5(%arg0: i32, %arg1: i32, %arg2: i32) -> (i32, i32, i32) {
    %0 = arith.muli %arg2, %arg1 : i32
    %c0_i32 = arith.constant 0 : i32
    %c0_i32_0 = arith.constant 0 : i32
    return %arg0, %c0_i32, %0 : i32, i32, i32
  }
}

</mosaic_0001>

<bundles_post_ra>
// kernel: tpu_custom_call.1
= control target key start
LH: loop header
LB: loop body
LE: loop exit
PB: predicated region body
PF: predicated region fallthrough
CT: control target
= control target key end

     0   :  { %10 = vsyncpa [#allocation6], 0  ;;  %s3181_s0 = inlined_call_operand.hbm [shape: f32[2,64,256], index: 0, kind: input, shape index: {}]   ;;  %s3182_s1 = inlined_call_operand.vmem [shape: f32[64,4], index: 1, kind: input, shape index: {}]   ;;  %s3183_s2 = inlined_call_operand.vmem [shape: f32[1,4], index: 2, kind: input, shape index: {}]   ;;  %s3184_s3 = inlined_call_operand.vmem [shape: f32[4,64], index: 3, kind: input, shape index: {}]   ;;  %s3185_s4 = inlined_call_operand.vmem [shape: f32[1,64], index: 4, kind: input, shape index: {}]   ;;  %s3186_s5 = inlined_call_operand.hbm [shape: f32[2,64,256], index: 5, kind: output, shape index: {}]  }
   0x1   :  { %12 = vsyncpa [#allocation6 + $0x1], 0 }
   0x2   :  { %13 = vsyncpa [#allocation7], 0 }
   0x3   :  { %15 = vsyncpa [#allocation7 + $0x1], 0  ;;  %s2580_s18 = smov 0   ;;  %s2582_s19 = smov 0  }
   0x4   :  { %s2584_s20 = smov 0   ;;  %s2586_s21 = smov 0  }
   0x5   :  { %s2588_s22 = smov 0   ;;  %s2590_s23 = smov 0  }
   0x6   :  { %s2592_s24 = smov 0   ;;  %s2594_s25 = smov 0  }
   0x7 LB: > { %s2247_s26 = sadd.s32 4294967295, %s2536_s25   ;;  %s2248_s27 = sadd.s32 4294967294, %s2536_s25   ;;  %s2536_s25 = sphi %s2594_s25, %s21_s25   ;;  %s2532_s24 = sphi %s2592_s24, %s3203_s24   ;;  %s2528_s23 = sphi %s2590_s23, %s3202_s23   ;;  %s2524_s22 = sphi %s2588_s22, %s3201_s22   ;;  %s2520_s21 = sphi %s2586_s21, %s3200_s21   ;;  %s2516_s20 = sphi %s2584_s20, %s3199_s20   ;;  %s2512_s19 = sphi %s2582_s19, %s3198_s19   ;;  %s2508_s18 = sphi %s2580_s18, %s3197_s18  }
   0x8   : > { %s36_s28 = sadd.s32 1, %s2528_s23  ;;  %s40_s29 = sadd.s32 1, %s2532_s24 }
   0x9   : > { %p38_p0 = scmp.ge.s32.totalorder %s36_s28, 2  ;;  %s49_s30 = sadd.s32 1, %s2516_s20 }
   0xa   : > { %p56_p1 = scmp.ne.s32.totalorder %s2516_s20, %s2512_s19  ;;  %p57_p2 = scmp.eq.s32.totalorder %s2536_s25, 0 }
   0xb   : > { %s3205_s28 = smov (%p38_p0, %s36_s28), 0  ;;  %s3207_s29 = smov (!%p38_p0, %s40_s29), %s2532_s24 }
   0xc   : > { %3188 = sst [smem:[#allocation11_spill]] %s3205_s28  ;;  %p2631_p3 = por %p57_p2, %p56_p1 }
   0xd   : > { %p62_p4 = scmp.ne.s32.totalorder %s2512_s19, %s2508_s18  ;;  %p42_p5 = scmp.ge.s32.totalorder %s3207_s29, 2 }
   0xe   : > { %p63_p6 = scmp.eq.s32.totalorder %s2247_s26, 0  ;;  %p174_p7 = scmp.eq.s32.totalorder %s2247_s26, 3 }
   0xf   : > { %p180_p8 = scmp.eq.s32.totalorder %s2248_s27, 3  ;;  %s3209_s29 = smov (%p42_p5, %s3207_s29), 0 }
  0x10   : > { %3190 = sst [smem:[#allocation12_spill]] %s3209_s29  ;;  %p2639_p9 = por %p63_p6, %p62_p4 }
  0x11   : > { %p2643_p10 = por %p174_p7, %p56_p1  ;;  %s44_s9 = ssub.s32 %s2532_s24, %s3209_s29 }
  0x12   : > { %p2649_p11 = por %p180_p8, %p62_p4  ;;  %p47_p12 = scmp.eq.s32.totalorder %s44_s9, 0 }
  0x13   : > { %p2326_p13 = scmp.lt.s32.totalorder %s2536_s25, 4  ;;  %s212_s11 = sand.u32 1, %s2516_s20  }
  0x14   : > { %s2656_s12 = scalar_select %p47_p12, %s2516_s20, %s49_s30  }
  0x15   : > { %s2251_s13 = sshll.u32 %s212_s11, 7  ;;  %s2275_s14 = sshll.u32 %s2532_s24, 11 }
  0x16   : > { %s224_s17 = scalar_lea.hbm %s3181_s0, %s2275_s14  ;;  %s216_s26 = scalar_lea.vmem [#allocation5], %s2251_s13 }
  0x17   : > { %s225_s27 = sshll.u32 %s216_s26, 4  ;;  %p2664_p0 = pnand %p2326_p13, %p2631_p3  ;;  %s226_s27 = int_to_ptr.vmem [resolvable:$true] %s225_s27 }
  0x18   : > { %p2254_p1 = scmp.ge.s32.totalorder %s2536_s25, 1  ;;  %s213_s9 = scalar_lea.sflag [#allocation6], %s212_s11 }
  0x19   : > { %p2414_p2 = pneg %p2664_p0  ;;  %s2425_s30 = scalar_lea.vmem %s226_s27, 2048 }
  0x1a   : > { %p2426_p4 = scmp.ne.s32.totalorder %s226_s27, %s2425_s30  ;;  %s2538_s28 = smov [#allocation5]  }
  0x1b   : > { %s2430_s15 = sshll.u32 %s2538_s28, 4  ;;  %s2431_s15 = int_to_ptr.vmem [resolvable:$false] %s2430_s15 }
  0x1c   : > { %p2428_p5 = pnand %p2426_p4, %p2414_p2  ;;  %s2432_s13 = scalar_lea.vmem %s2431_s15, 4096 }
  0x1d   : > { %p2433_p7 = scmp.lt.s32.totalorder %s226_s27, %s2431_s15  ;;  %p2434_p8 = scmp.lt.s32.totalorder %s2432_s13, %s2425_s30 }
  0x1e   : > { %p2429_p6 = pneg %p2428_p5 }
  0x1f   : > { %p2435_p12 = por %p2434_p8, %p2433_p7 }
  0x21   : > { %p2436_p3 = pnand %p2435_p12, %p2429_p6 }
  0x23   : > { %2439 = shalt.err (!%p2436_p3)
}
  0x24   : > { %s2539_s6 = smov 256   ;;  %s2540_s11 = smov 16  }
  0x25   : > { %2321 = dma.hbm_to_vmem [thread:$0]  (!%p2664_p0), %s224_s17, 2048, %s226_s27, %s213_s9, %s2539_s6, %s2539_s6, %s2540_s11  }
  0x26   : > { %p233_p13 = scmp.lt.s32.totalorder %s2536_s25, 5 }
  0x28   : > { %p234_p2 = pnand %p2254_p1, %p233_p13 }
  0x29   : > { %s2677_s28 = sand.u32 (!%p234_p2), 1, %s2512_s19  }
  0x2a   : > { %237 = sbr.rel (%p234_p2) target bundleno = 1070 (0x42e), region = 40  ;;  %s2255_s14 = sshll.u32 (!%p234_p2), %s2677_s28, 7 }
  0x2b   : > { %s240_s16 = scalar_lea.sflag (!%p234_p2), [#allocation6], %s2677_s28  ;;  %s2681_s26 = scalar_lea.vmem (!%p234_p2), [#allocation5], %s2255_s14 }
  0x2f   : > { %2499 = dma.done.wait (%p2639_p9), %s240_s16, 2048  }
  0x30   : > { %2501 = vsyncadd (%p2639_p9), %s240_s16, 4294965248  ;;  %p273_p0 = scmp.eq.s32.totalorder %s2520_s21, 0  ;;  %s2688_s29 = scalar_lea.vmem [#allocation8], %s2255_s14 }
  0x31   : > { %vm279_vm0 = vcmask (%p273_p0), 516096   ;;  %v2541_v0 = vmov (%p273_p0), 0.0   ;;  %v2542_v1 = vmov (%p273_p0), -inf  }
  0x32   : > { %278 = sbr.rel (!%p273_p0) target bundleno = 55 (0x37), region = 48  ;;  %280 = vst.msk [vmem:[#allocation2] sm:$0x1] (%p273_p0), %vm279_vm0, %v2541_v0  ;;  %281 = vst.msk [vmem:[#allocation3] sm:$0x1] (%p273_p0), %vm279_vm0, %v2542_v1 }
  0x37 PF: > { %p2258_p1 = scmp.ne.s32.totalorder %s2520_s21, 0 }
  0x39   : > { %284 = sbr.rel (%p2258_p1) target bundleno = 428 (0x1ac), region = 52 }
  0x3e   : > { %v285_v2 = vld [vmem:[%s2681_s26] sm:$0xff]  ;;  %v286_v3 = vld [vmem:[%s2681_s26 + $0x8] sm:$0xff]  ;;  %v287_v4 = vld [vmem:[%s2681_s26 + $0x10] sm:$0xff]  ;;  %v2543_v28 = vmov 0   ;;  %v334_v35 = vlaneseq  ;;  %v2544_v36 = vmov 1966171168  }
  0x3f   : > { %v1080_v5 = vmax.f32 %v285_v2, %v286_v3  ;;  %v302_v6 = vadd.f32 %v286_v3, %v285_v2  ;;  %v288_v7 = vld [vmem:[%s2681_s26 + $0x18] sm:$0xff]  ;;  %v289_v10 = vld [vmem:[%s2681_s26 + $0x20] sm:$0xff]  ;;  %v290_v11 = vld [vmem:[%s2681_s26 + $0x28] sm:$0xff]  ;;  %2402 = vset.pattern.permute.xlu0 %v2543_v28  ;;  %2403 = vset.pattern.permute.xlu1 %v2543_v28  ;;  %v595_v37 = vunpack.c.l.s4 %v2544_v36  ;;  %vm1017_vm1 = vcmask 130112  }
  0x40   : > { %v1083_v8 = vmax.f32 %v287_v4, %v288_v7  ;;  %v305_v9 = vadd.f32 %v288_v7, %v287_v4  ;;  %v1086_v12 = vmax.f32 %v289_v10, %v290_v11  ;;  %v308_v13 = vadd.f32 %v290_v11, %v289_v10  ;;  %v291_v14 = vld [vmem:[%s2681_s26 + $0x30] sm:$0xff]  ;;  %v292_v15 = vld [vmem:[%s2681_s26 + $0x38] sm:$0xff]  ;;  %v293_v18 = vld [vmem:[%s2681_s26 + $0x40] sm:$0xff] }
  0x41   : > { %1081 = vmax.xlane.f32.xlu1 %v1080_v5  ;;  %303 = vadd.xlane.f32.xlu0 %v302_v6  ;;  %v1089_v16 = vmax.f32 %v291_v14, %v292_v15  ;;  %v311_v17 = vadd.f32 %v292_v15, %v291_v14  ;;  %v294_v19 = vld [vmem:[%s2681_s26 + $0x48] sm:$0xff]  ;;  %v295_v22 = vld [vmem:[%s2681_s26 + $0x50] sm:$0xff]  ;;  %v296_v23 = vld [vmem:[%s2681_s26 + $0x58] sm:$0xff]  ;;  %v2708_v38 = vshrl.u32 %v334_v35, 7  ;;  %v596_v39 = vunpack.c.0.s8 %v595_v37 }
  0x42   : > { %v1092_v20 = vmax.f32 %v293_v18, %v294_v19  ;;  %v314_v21 = vadd.f32 %v294_v19, %v293_v18  ;;  %v1095_v24 = vmax.f32 %v295_v22, %v296_v23  ;;  %v317_v25 = vadd.f32 %v296_v23, %v295_v22  ;;  %v297_v26 = vld [vmem:[%s2681_s26 + $0x60] sm:$0xff]  ;;  %v298_v27 = vld [vmem:[%s2681_s26 + $0x68] sm:$0xff]  ;;  %v299_v31 = vld [vmem:[%s2681_s26 + $0x70] sm:$0xff] }
  0x43   : > { %v1098_v29 = vmax.f32 %v297_v26, %v298_v27  ;;  %v320_v30 = vadd.f32 %v298_v27, %v297_v26  ;;  %v300_v32 = vld [vmem:[%s2681_s26 + $0x78] sm:$0xff]  ;;  %v2711_v40 = vsub.s32 0, %v2708_v38  ;;  %v2714_v41 = vsub.s32 1, %v2708_v38 }
  0x44   : > { %v1101_v33 = vmax.f32 %v299_v31, %v300_v32  ;;  %v323_v34 = vadd.f32 %v300_v32, %v299_v31  ;;  %v2717_v42 = vsub.s32 2, %v2708_v38  ;;  %v2720_v43 = vsub.s32 3, %v2708_v38 }
  0x45   : > { %1084 = vmax.xlane.f32.xlu1 %v1083_v8  ;;  %306 = vadd.xlane.f32.xlu0 %v305_v9  ;;  %v2723_v44 = vsub.s32 4, %v2708_v38  ;;  %v2726_v45 = vsub.s32 5, %v2708_v38  ;;  %v2729_v46 = vsub.s32 6, %v2708_v38  ;;  %v2732_v47 = vsub.s32 7, %v2708_v38 }
  0x46   : > { %v2737_v50 = vsub.s32 %v596_v39, %v2708_v38  ;;  %vm1024_vm2 = vcmask 195712   ;;  %vm1031_vm3 = vcmask 261312   ;;  %vm1045_vm4 = vcmask 392512  }
  0x47   : > { %vm1038_vm5 = vcmask 326912   ;;  %vm1052_vm6 = vcmask 458112   ;;  %vm1059_vm7 = vcmask 523712   ;;  %vm1077_vm8 = vcmask 516096  }
  0x49   : > { %1087 = vmax.xlane.f32.xlu1 %v1086_v12  ;;  %309 = vadd.xlane.f32.xlu0 %v308_v13 }
  0x4d   : > { %1090 = vmax.xlane.f32.xlu1 %v1089_v16  ;;  %312 = vadd.xlane.f32.xlu0 %v311_v17 }
  0x51   : > { %1093 = vmax.xlane.f32.xlu1 %v1092_v20  ;;  %315 = vadd.xlane.f32.xlu0 %v314_v21 }
  0x55   : > { %1096 = vmax.xlane.f32.xlu1 %v1095_v24  ;;  %318 = vadd.xlane.f32.xlu0 %v317_v25 }
  0x59   : > { %1099 = vmax.xlane.f32.xlu1 %v1098_v29  ;;  %321 = vadd.xlane.f32.xlu0 %v320_v30 }
  0x5d   : > { %1102 = vmax.xlane.f32.xlu1 %v1101_v33  ;;  %324 = vadd.xlane.f32.xlu0 %v323_v34 }
  0xca   : > { %v2734_v48 = vpop.xlane.xlu1 %1081  ;;  %v304_v49 = vpop.xlane.xlu0 %303 }
  0xcb   : > { %v337_v51 = vrot.slane %v304_v49, %v2711_v40  ;;  %v341_v52 = vrot.slane %v304_v49, %v2714_v41  ;;  %v345_v53 = vrot.slane %v304_v49, %v2717_v42  ;;  %v349_v54 = vrot.slane %v304_v49, %v2720_v43 }
  0xcc   : > { %v353_v55 = vrot.slane %v304_v49, %v2723_v44  ;;  %v357_v56 = vrot.slane %v304_v49, %v2726_v45  ;;  %v361_v57 = vrot.slane %v304_v49, %v2729_v46  ;;  %v365_v58 = vrot.slane %v304_v49, %v2732_v47 }
  0xcd   : > { %v590_v59 = vcombine.low %v337_v51, %v341_v52  ;;  %v591_v60 = vcombine.low %v345_v53, %v349_v54  ;;  %v1115_v61 = vrot.slane %v2734_v48, %v2711_v40  ;;  %v1119_v62 = vrot.slane %v2734_v48, %v2714_v41 }
  0xce   : > { %v2751_v63 = vpop.xlane.xlu1 %1084  ;;  %v307_v0 = vpop.xlane.xlu0 %306  ;;  %v592_v1 = vcombine.low %v353_v55, %v357_v56  ;;  %v593_v2 = vcombine.low %v361_v57, %v365_v58  ;;  %v1123_v3 = vrot.slane %v2734_v48, %v2717_v42  ;;  %v1127_v4 = vrot.slane %v2734_v48, %v2720_v43 }
  0xcf   : > { %v600_v5 = vrot.slane %v590_v59, %v2737_v50  ;;  %v607_v6 = vrot.slane %v591_v60, %v2737_v50  ;;  %v369_v7 = vrot.slane %v307_v0, %v2711_v40  ;;  %v373_v8 = vrot.slane %v307_v0, %v2714_v41 }
  0xd0   : > { %v614_v9 = vrot.slane %v592_v1, %v2737_v50  ;;  %v621_v10 = vrot.slane %v593_v2, %v2737_v50  ;;  %v377_v11 = vrot.slane %v307_v0, %v2717_v42  ;;  %v381_v12 = vrot.slane %v307_v0, %v2720_v43 }
  0xd1   : > { %v622_v13 = vcombine.low %v600_v5, %v607_v6  ;;  %v385_v14 = vrot.slane %v307_v0, %v2723_v44  ;;  %v389_v15 = vrot.slane %v307_v0, %v2726_v45  ;;  %v393_v16 = vrot.slane %v307_v0, %v2729_v46 }
  0xd2   : > { %v2768_v17 = vpop.xlane.xlu1 %1087  ;;  %v310_v18 = vpop.xlane.xlu0 %309  ;;  %v623_v19 = vcombine.low %v614_v9, %v621_v10  ;;  %v397_v20 = vrot.slane %v307_v0, %v2732_v47  ;;  %v639_v21 = vcombine.low %v369_v7, %v373_v8  ;;  %v640_v22 = vcombine.low %v377_v11, %v381_v12 }
  0xd3   : > { %v630_v23 = vrot.slane %v622_v13, %v2737_v50  ;;  %v641_v24 = vcombine.low %v385_v14, %v389_v15  ;;  %v401_v25 = vrot.slane %v310_v18, %v2711_v40  ;;  %v405_v26 = vrot.slane %v310_v18, %v2714_v41 }
  0xd4   : > { %v637_v27 = vrot.slane %v623_v19, %v2737_v50  ;;  %v642_v28 = vcombine.low %v393_v16, %v397_v20  ;;  %v649_v29 = vrot.slane %v639_v21, %v2737_v50  ;;  %v656_v30 = vrot.slane %v640_v22, %v2737_v50 }
  0xd5   : > { %v663_v31 = vrot.slane %v641_v24, %v2737_v50  ;;  %v409_v32 = vrot.slane %v310_v18, %v2717_v42  ;;  %v413_v33 = vrot.slane %v310_v18, %v2720_v43  ;;  %v417_v34 = vrot.slane %v310_v18, %v2723_v44 }
  0xd6   : > { %v2781_v36 = vpop.xlane.xlu1 %1090  ;;  %v313_v37 = vpop.xlane.xlu0 %312  ;;  %v638_v39 = vcombine.low %v630_v23, %v637_v27  ;;  %v670_v49 = vrot.slane %v642_v28, %v2737_v50  ;;  %v671_v51 = vcombine.low %v649_v29, %v656_v30  ;;  %v421_v52 = vrot.slane %v310_v18, %v2726_v45 }
  0xd7   : > { %v425_v53 = vrot.slane %v310_v18, %v2729_v46  ;;  %v429_v54 = vrot.slane %v310_v18, %v2732_v47  ;;  %v688_v55 = vcombine.low %v401_v25, %v405_v26  ;;  %v689_v56 = vcombine.low %v409_v32, %v413_v33 }
  0xd8   : > { %983 = vperm.xlu0 %2402, %v638_v39   ;;  %v672_v57 = vcombine.low %v663_v31, %v670_v49  ;;  %v679_v58 = vrot.slane %v671_v51, %v2737_v50  ;;  %v690_v59 = vcombine.low %v417_v34, %v421_v52  ;;  %v433_v60 = vrot.slane %v313_v37, %v2711_v40 }
  0xd9   : > { %v691_v0 = vcombine.low %v425_v53, %v429_v54  ;;  %v698_v1 = vrot.slane %v688_v55, %v2737_v50  ;;  %v705_v2 = vrot.slane %v689_v56, %v2737_v50  ;;  %v437_v5 = vrot.slane %v313_v37, %v2714_v41 }
  0xda   : > { %v686_v6 = vrot.slane %v672_v57, %v2737_v50  ;;  %v712_v7 = vrot.slane %v690_v59, %v2737_v50  ;;  %v441_v8 = vrot.slane %v313_v37, %v2717_v42  ;;  %v445_v9 = vrot.slane %v313_v37, %v2720_v43  ;;  %v1094_v10 = vpop.xlane.xlu1 %1093  ;;  %v316_v32 = vpop.xlane.xlu0 %315 }
  0xdb   : > { %v719_v11 = vrot.slane %v691_v0, %v2737_v50  ;;  %v720_v12 = vcombine.low %v698_v1, %v705_v2  ;;  %v449_v13 = vrot.slane %v313_v37, %v2723_v44  ;;  %v453_v14 = vrot.slane %v313_v37, %v2726_v45 }
  0xdc   : > { %v687_v15 = vcombine.low %v679_v58, %v686_v6  ;;  %v457_v16 = vrot.slane %v313_v37, %v2729_v46  ;;  %v461_v18 = vrot.slane %v313_v37, %v2732_v47  ;;  %v737_v19 = vcombine.low %v433_v60, %v437_v5 }
  0xdd   : > { %v721_v20 = vcombine.low %v712_v7, %v719_v11  ;;  %v728_v21 = vrot.slane %v720_v12, %v2737_v50  ;;  %v738_v22 = vcombine.low %v441_v8, %v445_v9  ;;  %v739_v23 = vcombine.low %v449_v13, %v453_v14 }
  0xde   : > { %986 = vperm.xlu1 %2403, %v687_v15   ;;  %v740_v24 = vcombine.low %v457_v16, %v461_v18  ;;  %v747_v25 = vrot.slane %v737_v19, %v2737_v50  ;;  %v1243_v26 = vrot.slane %v1094_v10, %v2711_v40  ;;  %v1247_v27 = vrot.slane %v1094_v10, %v2714_v41  ;;  %v1097_v7 = vpop.xlane.xlu1 %1096 }
  0xdf   : > { %v735_v28 = vrot.slane %v721_v20, %v2737_v50  ;;  %v754_v29 = vrot.slane %v738_v22, %v2737_v50  ;;  %v761_v30 = vrot.slane %v739_v23, %v2737_v50  ;;  %v1251_v31 = vrot.slane %v1094_v10, %v2717_v42 }
  0xe0   : > { %v768_v33 = vrot.slane %v740_v24, %v2737_v50  ;;  %v1255_v34 = vrot.slane %v1094_v10, %v2720_v43  ;;  %v1259_v37 = vrot.slane %v1094_v10, %v2723_v44  ;;  %v1263_v39 = vrot.slane %v1094_v10, %v2726_v45 }
  0xe1   : > { %v736_v49 = vcombine.low %v728_v21, %v735_v28  ;;  %v769_v51 = vcombine.low %v747_v25, %v754_v29  ;;  %v1267_v52 = vrot.slane %v1094_v10, %v2729_v46  ;;  %v1271_v53 = vrot.slane %v1094_v10, %v2732_v47 }
  0xe2   : > { %v770_v54 = vcombine.low %v761_v30, %v768_v33  ;;  %v1564_v55 = vcombine.low %v1243_v26, %v1247_v27  ;;  %v1565_v56 = vcombine.low %v1251_v31, %v1255_v34  ;;  %v1566_v57 = vcombine.low %v1259_v37, %v1263_v39 }
  0xe3   : > { %989 = vperm.xlu1 %2403, %v736_v49   ;;  %v777_v58 = vrot.slane %v769_v51, %v2737_v50  ;;  %v1567_v59 = vcombine.low %v1267_v52, %v1271_v53  ;;  %v465_v60 = vrot.slane %v316_v32, %v2711_v40  ;;  %v469_v0 = vrot.slane %v316_v32, %v2714_v41 }
  0xe4   : > { %v784_v1 = vrot.slane %v770_v54, %v2737_v50  ;;  %v1574_v2 = vrot.slane %v1564_v55, %v2737_v50  ;;  %v1581_v5 = vrot.slane %v1565_v56, %v2737_v50  ;;  %v1588_v6 = vrot.slane %v1566_v57, %v2737_v50 }
  0xe5   : > { %v1595_v8 = vrot.slane %v1567_v59, %v2737_v50  ;;  %v473_v9 = vrot.slane %v316_v32, %v2717_v42  ;;  %v477_v10 = vrot.slane %v316_v32, %v2720_v43  ;;  %v481_v11 = vrot.slane %v316_v32, %v2723_v44 }
  0xe6   : > { %v785_v12 = vcombine.low %v777_v58, %v784_v1  ;;  %v1596_v13 = vcombine.low %v1574_v2, %v1581_v5  ;;  %v485_v14 = vrot.slane %v316_v32, %v2726_v45  ;;  %v489_v15 = vrot.slane %v316_v32, %v2729_v46  ;;  %v1100_v58 = vpop.xlane.xlu1 %1099 }
  0xe7   : > { %v1597_v16 = vcombine.low %v1588_v6, %v1595_v8  ;;  %v493_v18 = vrot.slane %v316_v32, %v2732_v47  ;;  %v786_v19 = vcombine.low %v465_v60, %v469_v0  ;;  %v787_v20 = vcombine.low %v473_v9, %v477_v10 }
  0xe8   : > { %992 = vperm.xlu1 %2403, %v785_v12   ;;  %v1604_v21 = vrot.slane %v1596_v13, %v2737_v50  ;;  %v788_v22 = vcombine.low %v481_v11, %v485_v14  ;;  %v1275_v23 = vrot.slane %v1097_v7, %v2711_v40  ;;  %v1279_v24 = vrot.slane %v1097_v7, %v2714_v41 }
  0xe9   : > { %v1611_v25 = vrot.slane %v1597_v16, %v2737_v50  ;;  %v789_v26 = vcombine.low %v489_v15, %v493_v18  ;;  %v796_v27 = vrot.slane %v786_v19, %v2737_v50  ;;  %v803_v28 = vrot.slane %v787_v20, %v2737_v50 }
  0xea   : > { %v810_v29 = vrot.slane %v788_v22, %v2737_v50  ;;  %v1283_v30 = vrot.slane %v1097_v7, %v2717_v42  ;;  %v1287_v31 = vrot.slane %v1097_v7, %v2720_v43  ;;  %v1291_v32 = vrot.slane %v1097_v7, %v2723_v44 }
  0xeb   : > { %v1612_v33 = vcombine.low %v1604_v21, %v1611_v25  ;;  %v817_v34 = vrot.slane %v789_v26, %v2737_v50  ;;  %v818_v37 = vcombine.low %v796_v27, %v803_v28  ;;  %v1295_v39 = vrot.slane %v1097_v7, %v2726_v45 }
  0xec   : > { %v1299_v49 = vrot.slane %v1097_v7, %v2729_v46  ;;  %v1303_v51 = vrot.slane %v1097_v7, %v2732_v47  ;;  %v1613_v52 = vcombine.low %v1275_v23, %v1279_v24  ;;  %v1614_v53 = vcombine.low %v1283_v30, %v1287_v31 }
  0xed   : > { %1773 = vperm.xlu0 %2402, %v1612_v33   ;;  %v819_v54 = vcombine.low %v810_v29, %v817_v34  ;;  %v826_v55 = vrot.slane %v818_v37, %v2737_v50  ;;  %v1615_v56 = vcombine.low %v1291_v32, %v1295_v39  ;;  %v1131_v57 = vrot.slane %v2734_v48, %v2723_v44 }
  0xee   : > { %v1616_v59 = vcombine.low %v1299_v49, %v1303_v51  ;;  %v1623_v60 = vrot.slane %v1613_v52, %v2737_v50  ;;  %v1630_v0 = vrot.slane %v1614_v53, %v2737_v50  ;;  %v1135_v1 = vrot.slane %v2734_v48, %v2726_v45  ;;  %v1103_v53 = vpop.xlane.xlu1 %1102 }
  0xef   : > { %v833_v2 = vrot.slane %v819_v54, %v2737_v50  ;;  %v1637_v5 = vrot.slane %v1615_v56, %v2737_v50  ;;  %v1139_v6 = vrot.slane %v2734_v48, %v2729_v46  ;;  %v1143_v7 = vrot.slane %v2734_v48, %v2732_v47 }
  0xf0   : > { %v1644_v8 = vrot.slane %v1616_v59, %v2737_v50  ;;  %v1645_v9 = vcombine.low %v1623_v60, %v1630_v0  ;;  %v1368_v10 = vcombine.low %v1115_v61, %v1119_v62  ;;  %v1369_v11 = vcombine.low %v1123_v3, %v1127_v4 }
  0xf1   : > { %v834_v12 = vcombine.low %v826_v55, %v833_v2  ;;  %v1370_v13 = vcombine.low %v1131_v57, %v1135_v1  ;;  %v1371_v14 = vcombine.low %v1139_v6, %v1143_v7  ;;  %v1307_v15 = vrot.slane %v1100_v58, %v2711_v40 }
  0xf2   : > { %v1646_v16 = vcombine.low %v1637_v5, %v1644_v8  ;;  %v1653_v18 = vrot.slane %v1645_v9, %v2737_v50  ;;  %v1378_v19 = vrot.slane %v1368_v10, %v2737_v50  ;;  %v1385_v20 = vrot.slane %v1369_v11, %v2737_v50 }
  0xf3   : > { %995 = vperm.xlu1 %2403, %v834_v12   ;;  %v1392_v61 = vrot.slane %v1370_v13, %v2737_v50  ;;  %v1399_v62 = vrot.slane %v1371_v14, %v2737_v50  ;;  %v1311_v48 = vrot.slane %v1100_v58, %v2714_v41  ;;  %v1315_v3 = vrot.slane %v1100_v58, %v2717_v42 }
  0xf4   : > { %v1660_v4 = vrot.slane %v1646_v16, %v2737_v50  ;;  %v1400_v21 = vcombine.low %v1378_v19, %v1385_v20  ;;  %v1319_v22 = vrot.slane %v1100_v58, %v2720_v43  ;;  %v1323_v23 = vrot.slane %v1100_v58, %v2723_v44 }
  0xf5   : > { %v1401_v24 = vcombine.low %v1392_v61, %v1399_v62  ;;  %v1327_v25 = vrot.slane %v1100_v58, %v2726_v45  ;;  %v1331_v26 = vrot.slane %v1100_v58, %v2729_v46  ;;  %v1335_v27 = vrot.slane %v1100_v58, %v2732_v47 }
  0xf6   : > { %v1661_v28 = vcombine.low %v1653_v18, %v1660_v4  ;;  %v1408_v29 = vrot.slane %v1400_v21, %v2737_v50  ;;  %v1662_v30 = vcombine.low %v1307_v15, %v1311_v48  ;;  %v1663_v31 = vcombine.low %v1315_v3, %v1319_v22 }
  0xf7   : > { %v1415_v32 = vrot.slane %v1401_v24, %v2737_v50  ;;  %v1664_v33 = vcombine.low %v1323_v23, %v1327_v25  ;;  %v1665_v34 = vcombine.low %v1331_v26, %v1335_v27  ;;  %v1147_v37 = vrot.slane %v2751_v63, %v2711_v40 }
  0xf8   : > { %1776 = vperm.xlu0 %2402, %v1661_v28   ;;  %v1672_v39 = vrot.slane %v1662_v30, %v2737_v50  ;;  %v1679_v49 = vrot.slane %v1663_v31, %v2737_v50  ;;  %v1151_v51 = vrot.slane %v2751_v63, %v2714_v41  ;;  %v1155_v52 = vrot.slane %v2751_v63, %v2717_v42 }
  0xf9   : > { %v1416_v54 = vcombine.low %v1408_v29, %v1415_v32  ;;  %v1686_v55 = vrot.slane %v1664_v33, %v2737_v50  ;;  %v1693_v56 = vrot.slane %v1665_v34, %v2737_v50  ;;  %v1159_v57 = vrot.slane %v2751_v63, %v2720_v43 }
  0xfa   : > { %v1694_v58 = vcombine.low %v1672_v39, %v1679_v49  ;;  %v1163_v59 = vrot.slane %v2751_v63, %v2723_v44  ;;  %v1167_v60 = vrot.slane %v2751_v63, %v2726_v45  ;;  %v1171_v0 = vrot.slane %v2751_v63, %v2729_v46 }
  0xfb   : > { %1761 = vperm.xlu1 %2403, %v1416_v54   ;;  %v1695_v1 = vcombine.low %v1686_v55, %v1693_v56  ;;  %v1175_v2 = vrot.slane %v2751_v63, %v2732_v47  ;;  %v1417_v5 = vcombine.low %v1147_v37, %v1151_v51  ;;  %v1418_v6 = vcombine.low %v1155_v52, %v1159_v57 }
  0xfc   : > { %v1702_v7 = vrot.slane %v1694_v58, %v2737_v50  ;;  %v1419_v8 = vcombine.low %v1163_v59, %v1167_v60  ;;  %v1339_v9 = vrot.slane %v1103_v53, %v2711_v40  ;;  %v1343_v10 = vrot.slane %v1103_v53, %v2714_v41  ;;  %v319_v59 = vpop.xlane.xlu0 %318 }
  0xfd   : > { %v1709_v11 = vrot.slane %v1695_v1, %v2737_v50  ;;  %v1420_v12 = vcombine.low %v1171_v0, %v1175_v2  ;;  %v1427_v13 = vrot.slane %v1417_v5, %v2737_v50  ;;  %v1434_v14 = vrot.slane %v1418_v6, %v2737_v50 }
  0xfe   : > { %v1441_v15 = vrot.slane %v1419_v8, %v2737_v50  ;;  %v1347_v63 = vrot.slane %v1103_v53, %v2717_v42  ;;  %v1351_v16 = vrot.slane %v1103_v53, %v2720_v43  ;;  %v1355_v18 = vrot.slane %v1103_v53, %v2723_v44 }
  0xff   : > { %v1710_v19 = vcombine.low %v1702_v7, %v1709_v11  ;;  %v1448_v20 = vrot.slane %v1420_v12, %v2737_v50  ;;  %v1449_v61 = vcombine.low %v1427_v13, %v1434_v14  ;;  %v1359_v62 = vrot.slane %v1103_v53, %v2726_v45 }
 0x100   : > { %v1363_v48 = vrot.slane %v1103_v53, %v2729_v46  ;;  %v1367_v3 = vrot.slane %v1103_v53, %v2732_v47  ;;  %v1711_v4 = vcombine.low %v1339_v9, %v1343_v10  ;;  %v1712_v21 = vcombine.low %v1347_v63, %v1351_v16 }
 0x101   : > { %1779 = vperm.xlu0 %2402, %v1710_v19   ;;  %v1450_v22 = vcombine.low %v1441_v15, %v1448_v20  ;;  %v1457_v23 = vrot.slane %v1449_v61, %v2737_v50  ;;  %v1713_v24 = vcombine.low %v1355_v18, %v1359_v62  ;;  %v1179_v25 = vrot.slane %v2768_v17, %v2711_v40 }
 0x102   : > { %v1714_v26 = vcombine.low %v1363_v48, %v1367_v3  ;;  %v1721_v27 = vrot.slane %v1711_v4, %v2737_v50  ;;  %v1728_v28 = vrot.slane %v1712_v21, %v2737_v50  ;;  %v1183_v29 = vrot.slane %v2768_v17, %v2714_v41  ;;  %v322_v3 = vpop.xlane.xlu0 %321 }
 0x103   : > { %v1464_v30 = vrot.slane %v1450_v22, %v2737_v50  ;;  %v1735_v31 = vrot.slane %v1713_v24, %v2737_v50  ;;  %v1187_v32 = vrot.slane %v2768_v17, %v2717_v42  ;;  %v1191_v33 = vrot.slane %v2768_v17, %v2720_v43 }
 0x104   : > { %v1742_v34 = vrot.slane %v1714_v26, %v2737_v50  ;;  %v1743_v37 = vcombine.low %v1721_v27, %v1728_v28  ;;  %v1195_v39 = vrot.slane %v2768_v17, %v2723_v44  ;;  %v1199_v49 = vrot.slane %v2768_v17, %v2726_v45 }
 0x105   : > { %v1465_v51 = vcombine.low %v1457_v23, %v1464_v30  ;;  %v1203_v52 = vrot.slane %v2768_v17, %v2729_v46  ;;  %v1207_v53 = vrot.slane %v2768_v17, %v2732_v47  ;;  %v1466_v54 = vcombine.low %v1179_v25, %v1183_v29 }
 0x106   : > { %v1744_v55 = vcombine.low %v1735_v31, %v1742_v34  ;;  %v1751_v56 = vrot.slane %v1743_v37, %v2737_v50  ;;  %v1467_v57 = vcombine.low %v1187_v32, %v1191_v33  ;;  %v1468_v58 = vcombine.low %v1195_v39, %v1199_v49 }
 0x107   : > { %1764 = vperm.xlu1 %2403, %v1465_v51   ;;  %v1469_v60 = vcombine.low %v1203_v52, %v1207_v53  ;;  %v1476_v0 = vrot.slane %v1466_v54, %v2737_v50  ;;  %v1211_v1 = vrot.slane %v2781_v36, %v2711_v40  ;;  %v1215_v2 = vrot.slane %v2781_v36, %v2714_v41 }
 0x108   : > { %v1758_v5 = vrot.slane %v1744_v55, %v2737_v50  ;;  %v1483_v17 = vrot.slane %v1467_v57, %v2737_v50  ;;  %v1490_v6 = vrot.slane %v1468_v58, %v2737_v50  ;;  %v1219_v7 = vrot.slane %v2781_v36, %v2717_v42 }
 0x109   : > { %v1497_v8 = vrot.slane %v1469_v60, %v2737_v50  ;;  %v1223_v9 = vrot.slane %v2781_v36, %v2720_v43  ;;  %v1227_v10 = vrot.slane %v2781_v36, %v2723_v44  ;;  %v1231_v11 = vrot.slane %v2781_v36, %v2726_v45 }
 0x10a   : > { %v1759_v12 = vcombine.low %v1751_v56, %v1758_v5  ;;  %v1498_v13 = vcombine.low %v1476_v0, %v1483_v17  ;;  %v1235_v14 = vrot.slane %v2781_v36, %v2729_v46  ;;  %v1239_v15 = vrot.slane %v2781_v36, %v2732_v47  ;;  %v325_v56 = vpop.xlane.xlu0 %324 }
 0x10b   : > { %v1499_v63 = vcombine.low %v1490_v6, %v1497_v8  ;;  %v1515_v16 = vcombine.low %v1211_v1, %v1215_v2  ;;  %v1516_v18 = vcombine.low %v1219_v7, %v1223_v9  ;;  %v1517_v19 = vcombine.low %v1227_v10, %v1231_v11 }
 0x10c   : > { %1782 = vperm.xlu0 %2402, %v1759_v12   ;;  %v1506_v20 = vrot.slane %v1498_v13, %v2737_v50  ;;  %v1518_v61 = vcombine.low %v1235_v14, %v1239_v15  ;;  %v497_v62 = vrot.slane %v319_v59, %v2711_v40  ;;  %v501_v48 = vrot.slane %v319_v59, %v2714_v41 }
 0x10d   : > { %v1513_v4 = vrot.slane %v1499_v63, %v2737_v50  ;;  %v1525_v21 = vrot.slane %v1515_v16, %v2737_v50  ;;  %v1532_v22 = vrot.slane %v1516_v18, %v2737_v50  ;;  %v1539_v36 = vrot.slane %v1517_v19, %v2737_v50 }
 0x10e   : > { %v1546_v23 = vrot.slane %v1518_v61, %v2737_v50  ;;  %v505_v24 = vrot.slane %v319_v59, %v2717_v42  ;;  %v509_v25 = vrot.slane %v319_v59, %v2720_v43  ;;  %v513_v26 = vrot.slane %v319_v59, %v2723_v44 }
 0x10f   : > { %v1514_v27 = vcombine.low %v1506_v20, %v1513_v4  ;;  %v1547_v28 = vcombine.low %v1525_v21, %v1532_v22  ;;  %v517_v29 = vrot.slane %v319_v59, %v2726_v45  ;;  %v521_v30 = vrot.slane %v319_v59, %v2729_v46 }
 0x110   : > { %v1548_v31 = vcombine.low %v1539_v36, %v1546_v23  ;;  %v525_v32 = vrot.slane %v319_v59, %v2732_v47  ;;  %v835_v33 = vcombine.low %v497_v62, %v501_v48  ;;  %v836_v34 = vcombine.low %v505_v24, %v509_v25 }
 0x111   : > { %1767 = vperm.xlu1 %2403, %v1514_v27   ;;  %v1555_v37 = vrot.slane %v1547_v28, %v2737_v50  ;;  %v837_v39 = vcombine.low %v513_v26, %v517_v29  ;;  %v529_v49 = vrot.slane %v322_v3, %v2711_v40  ;;  %v533_v51 = vrot.slane %v322_v3, %v2714_v41 }
 0x112   : > { %v1562_v52 = vrot.slane %v1548_v31, %v2737_v50  ;;  %v838_v53 = vcombine.low %v521_v30, %v525_v32  ;;  %v845_v54 = vrot.slane %v835_v33, %v2737_v50  ;;  %v852_v55 = vrot.slane %v836_v34, %v2737_v50 }
 0x113   : > { %v859_v57 = vrot.slane %v837_v39, %v2737_v50  ;;  %v537_v58 = vrot.slane %v322_v3, %v2717_v42  ;;  %v541_v59 = vrot.slane %v322_v3, %v2720_v43  ;;  %v545_v60 = vrot.slane %v322_v3, %v2723_v44 }
 0x114   : > { %v1563_v0 = vcombine.low %v1555_v37, %v1562_v52  ;;  %v866_v1 = vrot.slane %v838_v53, %v2737_v50  ;;  %v867_v2 = vcombine.low %v845_v54, %v852_v55  ;;  %v549_v5 = vrot.slane %v322_v3, %v2726_v45 }
 0x115   : > { %v553_v17 = vrot.slane %v322_v3, %v2729_v46  ;;  %v557_v6 = vrot.slane %v322_v3, %v2732_v47  ;;  %v884_v7 = vcombine.low %v529_v49, %v533_v51  ;;  %v885_v8 = vcombine.low %v537_v58, %v541_v59 }
 0x116   : > { %1770 = vperm.xlu1 %2403, %v1563_v0   ;;  %v868_v9 = vcombine.low %v859_v57, %v866_v1  ;;  %v875_v10 = vrot.slane %v867_v2, %v2737_v50  ;;  %v886_v11 = vcombine.low %v545_v60, %v549_v5  ;;  %v561_v12 = vrot.slane %v325_v56, %v2711_v40 }
 0x117   : > { %v887_v13 = vcombine.low %v553_v17, %v557_v6  ;;  %v894_v14 = vrot.slane %v884_v7, %v2737_v50  ;;  %v901_v15 = vrot.slane %v885_v8, %v2737_v50  ;;  %v565_v63 = vrot.slane %v325_v56, %v2714_v41 }
 0x118   : > { %v882_v16 = vrot.slane %v868_v9, %v2737_v50  ;;  %v908_v18 = vrot.slane %v886_v11, %v2737_v50  ;;  %v569_v19 = vrot.slane %v325_v56, %v2717_v42  ;;  %v573_v20 = vrot.slane %v325_v56, %v2720_v43 }
 0x119   : > { %v915_v61 = vrot.slane %v887_v13, %v2737_v50  ;;  %v916_v62 = vcombine.low %v894_v14, %v901_v15  ;;  %v577_v40 = vrot.slane %v325_v56, %v2723_v44  ;;  %v581_v48 = vrot.slane %v325_v56, %v2726_v45 }
 0x11a   : > { %v883_v3 = vcombine.low %v875_v10, %v882_v16  ;;  %v585_v4 = vrot.slane %v325_v56, %v2729_v46  ;;  %v589_v41 = vrot.slane %v325_v56, %v2732_v47  ;;  %v933_v21 = vcombine.low %v561_v12, %v565_v63 }
 0x11b   : > { %v917_v22 = vcombine.low %v908_v18, %v915_v61  ;;  %v924_v36 = vrot.slane %v916_v62, %v2737_v50  ;;  %v934_v23 = vcombine.low %v569_v19, %v573_v20  ;;  %v935_v42 = vcombine.low %v577_v40, %v581_v48 }
 0x11c   : > { %998 = vperm.xlu1 %2403, %v883_v3   ;;  %v936_v43 = vcombine.low %v585_v4, %v589_v41  ;;  %v943_v24 = vrot.slane %v933_v21, %v2737_v50  ;;  %v1007_v51 = vand.u32 127, %v334_v35 }
 0x11d   : > { %v931_v25 = vrot.slane %v917_v22, %v2737_v50  ;;  %v950_v44 = vrot.slane %v934_v23, %v2737_v50  ;;  %v957_v45 = vrot.slane %v935_v42, %v2737_v50  ;;  %v1079_v22 = vld [vmem:[#allocation3] sm:$0x1] }
 0x11e   : > { %v964_v46 = vrot.slane %v936_v43, %v2737_v50  ;;  %v1012_v54 = vadd.s32 4294967288, %v1007_v51  ;;  %v1019_v55 = vadd.s32 4294967280, %v1007_v51  ;;  %v1026_v57 = vadd.s32 4294967272, %v1007_v51 }
 0x11f   : > { %v932_v26 = vcombine.low %v924_v36, %v931_v25  ;;  %v965_v47 = vcombine.low %v943_v24, %v950_v44  ;;  %v1040_v58 = vadd.s32 4294967256, %v1007_v51  ;;  %v1033_v0 = vadd.s32 4294967264, %v1007_v51 }
 0x120   : > { %v966_v27 = vcombine.low %v957_v45, %v964_v46  ;;  %v1015_v56 = vsub.s32 %v1012_v54, %v2708_v38  ;;  %v1022_v60 = vsub.s32 %v1019_v55, %v2708_v38  ;;  %v1047_v1 = vadd.s32 4294967248, %v1007_v51 }
 0x121   : > { %1001 = vperm.xlu1 %2403, %v932_v26   ;;  %v973_v28 = vrot.slane %v965_v47, %v2737_v50  ;;  %v1010_v5 = vsub.s32 %v1007_v51, %v2708_v38  ;;  %v1054_v6 = vadd.s32 4294967240, %v1007_v51  ;;  %v1029_v35 = vsub.s32 %v1026_v57, %v2708_v38 }
 0x122   : > { %v980_v29 = vrot.slane %v966_v27, %v2737_v50  ;;  %v1043_v9 = vsub.s32 %v1040_v58, %v2708_v38  ;;  %v1036_v10 = vsub.s32 %v1033_v0, %v2708_v38  ;;  %v1050_v11 = vsub.s32 %v1047_v1, %v2708_v38 }
 0x123   : > { %v1057_v14 = vsub.s32 %v1054_v6, %v2708_v38 }
 0x124   : > { %v981_v30 = vcombine.low %v973_v28, %v980_v29 }
 0x126   : > { %1004 = vperm.xlu1 %2403, %v981_v30  }
 0x153   : > { %v984_v37 = vpop.permute.xlu0 %983 }
 0x154   : > { %v1011_v42 = vrot.slane %v984_v37, %v1010_v5  ;;  %v301_v37 = vld [vmem:[#allocation2] sm:$0x1] }
 0x159   : > { %v3013_v31 = vpop.permute.xlu1 %986 }
 0x15a   : > { %v1016_v21 = vrot.slane %v3013_v31, %v1015_v56 }
 0x15c   : > { %v1018_v45 = vsel %vm1017_vm1, %v1016_v21, %v1011_v42 }
 0x15e   : > { %v3015_v32 = vpop.permute.xlu1 %989 }
 0x15f   : > { %v1023_v36 = vrot.slane %v3015_v32, %v1022_v60 }
 0x161   : > { %v1025_v26 = vsel %vm1024_vm2, %v1023_v36, %v1018_v45 }
 0x163   : > { %v3017_v33 = vpop.permute.xlu1 %992 }
 0x164   : > { %v1030_v43 = vrot.slane %v3017_v33, %v1029_v35 }
 0x166   : > { %v1032_v27 = vsel %vm1031_vm3, %v1030_v43, %v1025_v26 }
 0x168   : > { %v1774_v49 = vpop.permute.xlu0 %1773 }
 0x169   : > { %v1806_v63 = vrot.slane %v1774_v49, %v1036_v10 }
 0x16e   : > { %v3019_v34 = vpop.permute.xlu1 %995 }
 0x16f   : > { %v1037_v25 = vrot.slane %v3019_v34, %v1036_v10 }
 0x171   : > { %v1039_v28 = vsel %vm1038_vm5, %v1037_v25, %v1032_v27 }
 0x173   : > { %v1777_v53 = vpop.permute.xlu0 %1776 }
 0x174   : > { %v1811_v19 = vrot.slane %v1777_v53, %v1043_v9 }
 0x176   : > { %v1762_v39 = vpop.permute.xlu1 %1761 }
 0x177   : > { %v1787_v8 = vrot.slane %v1762_v39, %v1010_v5 }
 0x17c   : > { %v1780_v2 = vpop.permute.xlu0 %1779 }
 0x17d   : > { %v1816_v61 = vrot.slane %v1780_v2, %v1050_v11 }
 0x182   : > { %v1765_v52 = vpop.permute.xlu1 %1764 }
 0x183   : > { %v1791_v17 = vrot.slane %v1765_v52, %v1015_v56 }
 0x185   : > { %v1792_v13 = vsel %vm1017_vm1, %v1791_v17, %v1787_v8 }
 0x187   : > { %v1783_v18 = vpop.permute.xlu0 %1782 }
 0x188   : > { %v1821_v40 = vrot.slane %v1783_v18, %v1057_v14 }
 0x18c   : > { %v1768_v59 = vpop.permute.xlu1 %1767 }
 0x18d   : > { %v1796_v7 = vrot.slane %v1768_v59, %v1022_v60 }
 0x18f   : > { %v1797_v16 = vsel %vm1024_vm2, %v1796_v7, %v1792_v13 }
 0x191   : > { %v1771_v12 = vpop.permute.xlu1 %1770 }
 0x192   : > { %v1801_v15 = vrot.slane %v1771_v12, %v1029_v35 }
 0x194   : > { %v1802_v20 = vsel %vm1031_vm3, %v1801_v15, %v1797_v16 }
 0x195   : > { %v1807_v62 = vsel %vm1038_vm5, %v1806_v63, %v1802_v20 }
 0x196   : > { %v1812_v48 = vsel %vm1045_vm4, %v1811_v19, %v1807_v62 }
 0x197   : > { %v999_v38 = vpop.permute.xlu1 %998  ;;  %v1817_v3 = vsel %vm1052_vm6, %v1816_v61, %v1812_v48 }
 0x198   : > { %v1822_v4 = vsel %vm1059_vm7, %v1821_v40, %v1817_v3  ;;  %v1044_v46 = vrot.slane %v999_v38, %v1043_v9 }
 0x199   : > { %v1829_v41 = vrot.slane %v1822_v4, %v2737_v50 }
 0x19a   : > { %v1046_v30 = vsel %vm1045_vm4, %v1044_v46, %v1039_v28 }
 0x19b   : > { %v1836_v23 = vrot.slane %v1829_v41, %v2737_v50 }
 0x19c   : > { %v1002_v24 = vpop.permute.xlu1 %1001 }
 0x19d   : > { %v1838_v44 = vmax.f32 %v1079_v22, %v1836_v23  ;;  %v1051_v47 = vrot.slane %v1002_v24, %v1050_v11 }
 0x19f   : > { %1839 = vst.msk [vmem:[#allocation3] sm:$0x1] %vm1077_vm8, %v1838_v44  ;;  %v1053_v32 = vsel %vm1052_vm6, %v1051_v47, %v1046_v30 }
 0x1a1   : > { %v1005_v29 = vpop.permute.xlu1 %1004 }
 0x1a2   : > { %v1058_v31 = vrot.slane %v1005_v29, %v1057_v14 }
 0x1a4   : > { %v1060_v33 = vsel %vm1059_vm7, %v1058_v31, %v1053_v32 }
 0x1a5   : > { %v1067_v34 = vrot.slane %v1060_v33, %v2737_v50 }
 0x1a7   : > { %v1074_v39 = vrot.slane %v1067_v34, %v2737_v50 }
 0x1a9   : > { %v1076_v49 = vadd.f32 %v1074_v39, %v301_v37 }
 0x1ab   : > { %1078 = vst.msk [vmem:[#allocation2] sm:$0x1] %vm1077_vm8, %v1076_v49 }
 0x1ac PF: > { %p1840_p9 = scmp.eq.s32.totalorder %s2520_s21, 1 }
 0x1ad   : > { %v1863_v51 = vld [vmem:[%s3182_s1 + $0x38] sm:$0xff] (%p1840_p9)  ;;  %v2545_v52 = vmov (%p1840_p9), 0.0   ;;  %v1862_v53 = vld [vmem:[%s3182_s1 + $0x30] sm:$0xff] (%p1840_p9)  ;;  %vm2546_vm9 = vmmov (%p1840_p9), 0   ;;  %v1861_v50 = vld [vmem:[%s3182_s1 + $0x28] sm:$0xff] (%p1840_p9)  ;;  %vm1854_vm10 = vcmask (%p1840_p9), 1040384  }
 0x1ae   : > { %1844 = sbr.rel (!%p1840_p9) target bundleno = 907 (0x38b), region = 56  ;;  %2290 = vmatprep.subr.mxu0 (%p1840_p9), %v2545_v52  ;;  %2306 = vmatprep.mubr.msk.f32.mxu0 (%p1840_p9), %vm2546_vm9, %v2545_v52  ;;  %v1860_v54 = vld [vmem:[%s3182_s1 + $0x20] sm:$0xff] (%p1840_p9)  ;;  %v1859_v55 = vld [vmem:[%s3182_s1 + $0x18] sm:$0xff] (%p1840_p9)  ;;  %v1858_v57 = vld [vmem:[%s3182_s1 + $0x10] sm:$0xff] (%p1840_p9)  ;;  %vm1871_vm11 = vcmask (%p1840_p9), 523264   ;;  %vm1964_vm12 = vcmask (%p1840_p9), 1043456  }
 0x1af   : > { %2291 = vmatpush3.msra.mxu0 (%p1840_p9), %v1863_v51  ;;  %2309 = vmatprep.subr.mxu1 (%p1840_p9), %v2545_v52  ;;  %v1857_v59 = vld [vmem:[%s3182_s1 + $0x8] sm:$0xff] (%p1840_p9)  ;;  %v2260_v60 = vld [vmem:[#allocation3] ss:$0 sm:$0xff] (%p1840_p9)  ;;  %v2261_v5 = vld [vmem:[%s3183_s2] ss:$0 sm:$0xff] (%p1840_p9)  ;;  %vm1960_vm13 = vcmask (%p1840_p9), 31744  }
 0x1b0   : > { %2292 = vmatprep.subr.mxu0 (%p1840_p9), %v2545_v52  ;;  %2311 = vmatprep.mubr.msk.f32.mxu1 (%p1840_p9), %vm2546_vm9, %v2545_v52  ;;  %v1856_v0 = vld [vmem:[%s3182_s1] sm:$0xff] (%p1840_p9)  ;;  %vm2048_vm14 = vcmask (%p1840_p9), 516096  }
 0x1b1   : > { %2293 = vmatpush3.msra.mxu0 (%p1840_p9), %v1862_v53  ;;  %v1952_v2 = vld [vmem:[%s3184_s3] sm:$0xf] (%p1840_p9) }
 0x1b2   : > { %2294 = vmatprep.subr.mxu0 (%p1840_p9), %v2545_v52  ;;  %v1845_v56 = vld [vmem:[#allocation2] sm:$0x1] (%p1840_p9)  ;;  %2310 = vmatpush3.msk.msra.mxu1 (%p1840_p9), %vm1964_vm12, %v1952_v2 }
 0x1b3   : > { %2295 = vmatpush3.msra.mxu0 %v1861_v50  ;;  %v1846_v58 = vmul.f32 0.00390625, %v1845_v56  ;;  %v2264_v12 = vld [vmem:[%s3185_s4] ss:$0 sm:$0xff] }
 0x1b4   : > { %2296 = vmatprep.subr.mxu0 %v2545_v52 }
 0x1b5   : > { %2297 = vmatpush3.msra.mxu0 %v1860_v54  ;;  %v1855_v1 = vsel %vm1854_vm10, %v1846_v58, %v2260_v60 }
 0x1b6   : > { %2298 = vmatprep.subr.mxu0 %v2545_v52 }
 0x1b7   : > { %2299 = vmatpush3.msra.mxu0 %v1859_v55 }
 0x1b8   : > { %2300 = vmatprep.subr.mxu0 %v2545_v52 }
 0x1b9   : > { %2301 = vmatpush3.msra.mxu0 %v1858_v57 }
 0x1ba   : > { %2302 = vmatprep.subr.mxu0 %v2545_v52 }
 0x1bb   : > { %2303 = vmatpush3.msra.mxu0 %v1857_v59 }
 0x1bc   : > { %2304 = vmatprep.subr.mxu0 %v2545_v52 }
 0x1bd   : > { %2305 = vmatpush3.msra.mxu0 %v1856_v0 }
 0x1be   : > { %2307 = vmatmul.mubr.msk.f32.vlgmr.msra.gmra.mxu0 %vm1871_vm11, %v1855_v1 }
 0x27e   : > { %v1941_v17 = vpop.f32.mrf.mxu0 }
 0x27f   : > { %v1942_v6 = vadd.f32 %v2261_v5, %v1941_v17 }
 0x280   : > { %v2308_v7 = vpop.f32.mrf.mxu0 }
 0x281   : > { %v2263_v35 = vmul.f32 -1.442695, %v1942_v6 }
 0x283   : > { %2404 = vpow2.f32 %v2263_v35 }
 0x290   : > { %v2405_v8 = vpop.eup %2404 }
 0x291   : > { %v1948_v9 = vadd.f32 1.0, %v2405_v8 }
 0x293   : > { %2406 = vrcp.f32 %v1948_v9 }
 0x2a0   : > { %v2407_v10 = vpop.eup %2406 }
 0x2a1   : > { %v1951_v11 = vmul.f32 %v2407_v10, %v1942_v6 }
 0x2a3   : > { %2312 = vmatmul.mubr.msk.f32.vlgmr.msra.gmra.mxu1 %vm1960_vm13, %v1951_v11 }
 0x363   : > { %v2034_v13 = vpop.f32.mrf.mxu1 }
 0x364   : > { %v2035_v14 = vadd.f32 %v2264_v12, %v2034_v13 }
 0x365   : > { %v2313_v15 = vpop.f32.mrf.mxu1 }
 0x366   : > { %v2039_v63 = vrot.slane %v2035_v14, 1 }
 0x368   : > { %v2041_v16 = vadd.f32 %v2039_v63, %v2035_v14 }
 0x36a   : > { %v2267_v18 = vmul.f32 -1.442695, %v2041_v16 }
 0x36c   : > { %2408 = vpow2.f32 %v2267_v18 }
 0x379   : > { %v2409_v19 = vpop.eup %2408 }
 0x37a   : > { %v2045_v20 = vadd.f32 1.0, %v2409_v19 }
 0x37c   : > { %2410 = vrcp.f32 %v2045_v20 }
 0x389   : > { %v2411_v61 = vpop.eup %2410 }
 0x38a   : > { %2049 = vst.msk [vmem:[#allocation4] sm:$0x1] %vm2048_vm14, %v2411_v61 }
 0x38b PF: > { %p2268_p4 = scmp.ne.s32.totalorder %s2520_s21, 1 }
 0x38d   : > { %2052 = sbr.rel (%p2268_p4) target bundleno = 1046 (0x416), region = 60 }
 0x392   : > { %v2269_v62 = vld [vmem:[#allocation4] ss:$0 sm:$0xff]  ;;  %v2058_v40 = vld [vmem:[%s2681_s26 + $0x20] sm:$0xff]  ;;  %v2059_v48 = vld [vmem:[%s2681_s26 + $0x28] sm:$0xff] }
 0x393   : > { %2083 = vbcast.lane.b32.xlu1 %v2269_v62, 272  ;;  %2075 = vbcast.lane.b32.xlu0 %v2269_v62, 256  ;;  %v2054_v38 = vld [vmem:[%s2681_s26] sm:$0xff]  ;;  %v2055_v3 = vld [vmem:[%s2681_s26 + $0x8] sm:$0xff]  ;;  %v2060_v42 = vld [vmem:[%s2681_s26 + $0x30] sm:$0xff] }
 0x394   : > { %v2061_v43 = vld [vmem:[%s2681_s26 + $0x38] sm:$0xff]  ;;  %v2056_v24 = vld [vmem:[%s2681_s26 + $0x10] sm:$0xff]  ;;  %v2062_v30 = vld [vmem:[%s2681_s26 + $0x40] sm:$0xff] }
 0x395   : > { %v2057_v25 = vld [vmem:[%s2681_s26 + $0x18] sm:$0xff]  ;;  %v2064_v28 = vld [vmem:[%s2681_s26 + $0x50] sm:$0xff]  ;;  %v2063_v31 = vld [vmem:[%s2681_s26 + $0x48] sm:$0xff] }
 0x396   : > { %v2065_v29 = vld [vmem:[%s2681_s26 + $0x58] sm:$0xff]  ;;  %v2068_v51 = vld [vmem:[%s2681_s26 + $0x70] sm:$0xff]  ;;  %v2066_v53 = vld [vmem:[%s2681_s26 + $0x60] sm:$0xff] }
 0x397   : > { %2087 = vbcast.lane.b32.xlu1 %v2269_v62, 280  ;;  %2079 = vbcast.lane.b32.xlu0 %v2269_v62, 264  ;;  %v2069_v52 = vld [vmem:[%s2681_s26 + $0x78] sm:$0xff]  ;;  %v2067_v50 = vld [vmem:[%s2681_s26 + $0x68] sm:$0xff] }
 0x39b   : > { %2095 = vbcast.lane.b32.xlu1 %v2269_v62, 296  ;;  %2091 = vbcast.lane.b32.xlu0 %v2269_v62, 288 }
 0x39f   : > { %2103 = vbcast.lane.b32.xlu1 %v2269_v62, 312  ;;  %2099 = vbcast.lane.b32.xlu0 %v2269_v62, 304 }
 0x405   : > { %v2084_v4 = vpop.permute.xlu1 %2083  ;;  %v2076_v41 = vpop.permute.xlu0 %2075 }
 0x406   : > { %v2109_v21 = vmul.f32 %v2084_v4, %v2058_v40  ;;  %v2110_v22 = vmul.f32 %v2084_v4, %v2059_v48  ;;  %v2105_v36 = vmul.f32 %v2076_v41, %v2054_v38  ;;  %v2106_v23 = vmul.f32 %v2076_v41, %v2055_v3 }
 0x408   : > { %2125 = vst [vmem:[%s2688_s29 + $0x20] sm:$0xff] %v2109_v21  ;;  %2126 = vst [vmem:[%s2688_s29 + $0x28] sm:$0xff] %v2110_v22 }
 0x409   : > { %2121 = vst [vmem:[%s2688_s29] sm:$0xff] %v2105_v36  ;;  %2122 = vst [vmem:[%s2688_s29 + $0x8] sm:$0xff] %v2106_v23  ;;  %v2088_v44 = vpop.permute.xlu1 %2087  ;;  %v2080_v45 = vpop.permute.xlu0 %2079 }
 0x40a   : > { %v2111_v46 = vmul.f32 %v2088_v44, %v2060_v42  ;;  %v2112_v26 = vmul.f32 %v2088_v44, %v2061_v43  ;;  %v2107_v47 = vmul.f32 %v2080_v45, %v2056_v24  ;;  %v2108_v27 = vmul.f32 %v2080_v45, %v2057_v25 }
 0x40c   : > { %2127 = vst [vmem:[%s2688_s29 + $0x30] sm:$0xff] %v2111_v46  ;;  %2128 = vst [vmem:[%s2688_s29 + $0x38] sm:$0xff] %v2112_v26 }
 0x40d   : > { %2123 = vst [vmem:[%s2688_s29 + $0x10] sm:$0xff] %v2107_v47  ;;  %2124 = vst [vmem:[%s2688_s29 + $0x18] sm:$0xff] %v2108_v27  ;;  %v2096_v32 = vpop.permute.xlu1 %2095  ;;  %v2092_v33 = vpop.permute.xlu0 %2091 }
 0x40e   : > { %v2115_v34 = vmul.f32 %v2096_v32, %v2064_v28  ;;  %v2116_v37 = vmul.f32 %v2096_v32, %v2065_v29  ;;  %v2113_v39 = vmul.f32 %v2092_v33, %v2062_v30  ;;  %v2114_v49 = vmul.f32 %v2092_v33, %v2063_v31 }
 0x410   : > { %2131 = vst [vmem:[%s2688_s29 + $0x50] sm:$0xff] %v2115_v34  ;;  %2132 = vst [vmem:[%s2688_s29 + $0x58] sm:$0xff] %v2116_v37 }
 0x411   : > { %2129 = vst [vmem:[%s2688_s29 + $0x40] sm:$0xff] %v2113_v39  ;;  %2130 = vst [vmem:[%s2688_s29 + $0x48] sm:$0xff] %v2114_v49  ;;  %v2104_v54 = vpop.permute.xlu1 %2103  ;;  %v2100_v55 = vpop.permute.xlu0 %2099 }
 0x412   : > { %v2119_v56 = vmul.f32 %v2104_v54, %v2068_v51  ;;  %v2120_v57 = vmul.f32 %v2104_v54, %v2069_v52  ;;  %v2117_v58 = vmul.f32 %v2100_v55, %v2066_v53  ;;  %v2118_v59 = vmul.f32 %v2100_v55, %v2067_v50 }
 0x414   : > { %2135 = vst [vmem:[%s2688_s29 + $0x70] sm:$0xff] %v2119_v56  ;;  %2136 = vst [vmem:[%s2688_s29 + $0x78] sm:$0xff] %v2120_v57 }
 0x415   : > { %2133 = vst [vmem:[%s2688_s29 + $0x60] sm:$0xff] %v2117_v58  ;;  %2134 = vst [vmem:[%s2688_s29 + $0x68] sm:$0xff] %v2118_v59 }
 0x416 PF: > { %s2278_s21 = sshll.u32 %s2524_s22, 11  ;;  %s2154_s27 = sshll.u32 %s2688_s29, 4  ;;  %s3128_s27 = int_to_ptr.vmem [resolvable:$true] %s2154_s27 }
 0x417   : > { %s3125_s17 = scalar_lea.hbm %s3186_s5, %s2278_s21  ;;  %s2138_s9 = scalar_lea.sflag [#allocation7], %s2677_s28 }
 0x418   : > { %s2440_s30 = scalar_lea.vmem %s3128_s27, 2048  ;;  %s2547_s15 = smov [#allocation8]  }
 0x419   : > { %p2441_p5 = scmp.ne.s32.totalorder %s3128_s27, %s2440_s30  ;;  %s2444_s13 = sshll.u32 %s2547_s15, 4  ;;  %s2445_s13 = int_to_ptr.vmem [resolvable:$false] %s2444_s13 }
 0x41a   : > { %s2446_s22 = scalar_lea.vmem %s2445_s13, 4096  ;;  %p2447_p8 = scmp.lt.s32.totalorder %s3128_s27, %s2445_s13 }
 0x41b   : > { %p2442_p6 = pnand %p2441_p5, %p2643_p10  ;;  %p2448_p12 = scmp.lt.s32.totalorder %s2446_s22, %s2440_s30 }
 0x41d   : > { %p2443_p7 = pneg %p2442_p6  ;;  %p2449_p3 = por %p2448_p12, %p2447_p8 }
 0x41f   : > { %p2450_p13 = pnand %p2449_p3, %p2443_p7 }
 0x421   : > { %2453 = shalt.err (!%p2450_p13)
}
 0x422   : > { %s2454_s29 = scalar_lea.hbm %s3125_s17, 2048  ;;  %s2458_s14 = scalar_lea.hbm %s3186_s5, 4096 }
 0x423   : > { %p2455_p2 = scmp.ne.s32.totalorder %s3125_s17, %s2454_s29  ;;  %p2459_p9 = scmp.lt.s32.totalorder %s3125_s17, %s3186_s5 }
 0x424   : > { %p2460_p4 = scmp.lt.s32.totalorder %s2458_s14, %s2454_s29 }
 0x425   : > { %p2456_p0 = pnand %p2455_p2, %p2643_p10 }
 0x426   : > { %p2461_p5 = por %p2460_p4, %p2459_p9 }
 0x427   : > { %p2457_p1 = pneg %p2456_p0 }
 0x429   : > { %p2462_p6 = pnand %p2461_p5, %p2457_p1 }
 0x42b   : > { %2465 = shalt.err (!%p2462_p6)
}
 0x42c   : > { %s2548_s26 = smov 256   ;;  %s2549_s7 = smov 16  }
 0x42d   : > { %2316 = dma.vmem_to_hbm [thread:$0]  (%p2643_p10), %s3128_s27, 2048, %s3125_s17, %s2138_s9, %s2548_s26, %s2548_s26, %s2549_s7  }
 0x42e PF: > { %p2327_p7 = scmp.ge.s32.totalorder %s2536_s25, 2  ;;  %s2169_s30 = sand.u32 1, %s2508_s18  }
 0x42f   : > { %s2170_s15 = scalar_lea.sflag [#allocation7], %s2169_s30 }
 0x430   : > { %p2323_p8 = pnand %p2327_p7, %p2649_p11 }
 0x432   : > { %p2324_p12 = pneg %p2323_p8 }
 0x434   : > { %2503 = dma.done.wait (%p2324_p12), %s2170_s15, 2048  }
 0x435   : > { %2505 = vsyncadd (%p2324_p12), %s2170_s15, 4294965248  ;;  %s21_s25 = sadd.s32 1, %s2536_s25   ;;  %s3195_s8 = sld [smem:[#allocation11_spill]] }
 0x436   : > { %p18_p3 = scmp.ge.s32.totalorder %s21_s25, 6   ;;  %s3196_s28 = sld [smem:[#allocation12_spill]] }
 0x437   : > { %s3197_s18 = smov %s2512_s19  ;;  %s3198_s19 = smov %s2516_s20 }
 0x438   : > { %s3199_s20 = smov %s2656_s12  ;;  %s3200_s21 = smov %s2528_s23 }
 0x439   : > { %s3201_s22 = smov %s2532_s24  ;;  %20 = sbr.rel (!%p18_p3) target bundleno = 7 (0x7), region = 101 }
 0x43b   : > { %s3202_s23 = smov %s3195_s8 }
 0x43c   : > { %s3203_s24 = smov %s3196_s28 }
 0x43e   :  { %2175 = vsyncpa [#allocation6], 1 }
 0x43f   :  { %2177 = vsyncpa [#allocation6 + $0x1], 1 }
 0x440   :  { %2178 = vsyncpa [#allocation7], 1 }
 0x441   :  { %2180 = vsyncpa [#allocation7 + $0x1], 1 }

</bundles_post_ra>
